<compile_context>
chip_gen: v5e
topology: v5e:2x2
jax: 0.10.0
libtpu: 0.0.40
codegen_flags: <defaults>
</compile_context>

<pallas_src>
import math
import functools

import jax
import jax.numpy as jnp
from jax.experimental import pallas as pl
from jax.experimental.pallas import tpu as pltpu

MXU_DTYPE = jnp.bfloat16   # MXU operand dtype (weights stored like this)
ACT_DTYPE = jnp.bfloat16   # activation dtype written back to HBM
LN_EPS = 1e-12
VMEM_LIMIT = 32 * 1024 * 1024   # >= scoped default on v5e/v6e/v7x, < v7x physical


# --------------------------------------------------------------------------
# Shared in-kernel helpers (all f32 math)
# --------------------------------------------------------------------------
def _layernorm_f32(s, gamma, beta, eps):
    mean = jnp.mean(s, axis=-1, keepdims=True)
    var = jnp.mean(jnp.square(s - mean), axis=-1, keepdims=True)
    return (s - mean) * jax.lax.rsqrt(var + eps) * gamma + beta


def _linear_epilogue(y, b_ref, res_ref, g_ref, bln_ref, o_ref, *, activation, eps):
    """bias (+gelu) (+residual-add + LayerNorm) epilogue; single bf16 store."""
    y = y + b_ref[...].astype(jnp.float32)
    if activation == "gelu":                              # exact (erf) GELU, like BERT
        y = 0.5 * y * (1.0 + jax.lax.erf(y * (1.0 / math.sqrt(2.0))))
    if res_ref is not None:                               # fused residual + LN
        y = _layernorm_f32(y + res_ref[...].astype(jnp.float32),
                           g_ref[...].astype(jnp.float32),
                           bln_ref[...].astype(jnp.float32), eps)
    o_ref[...] = y.astype(o_ref.dtype)


# --------------------------------------------------------------------------
# Linear (optionally fused with gelu, or with residual-add + LayerNorm)
# --------------------------------------------------------------------------
def _linear_kernel(x_ref, w_ref, b_ref, *rest, activation, eps, fused_ln):
    """Single K step: no accumulator scratch, write the output tile directly."""
    if fused_ln:
        res_ref, g_ref, bln_ref, o_ref = rest
    else:
        (o_ref,) = rest
        res_ref = g_ref = bln_ref = None
    y = jnp.dot(x_ref[...], w_ref[...], preferred_element_type=jnp.float32)
    _linear_epilogue(y, b_ref, res_ref, g_ref, bln_ref, o_ref,
                     activation=activation, eps=eps)


def _linear_kernel_kacc(x_ref, w_ref, b_ref, *rest, activation, eps, fused_ln):
    """K-tiled path: f32 accumulator scratch, pl.when init/finalize (P3)."""
    if fused_ln:
        res_ref, g_ref, bln_ref, o_ref, acc_ref = rest
    else:
        o_ref, acc_ref = rest
        res_ref = g_ref = bln_ref = None

    @pl.when(pl.program_id(1) == 0)
    def _():
        acc_ref[...] = jnp.zeros_like(acc_ref)

    acc_ref[...] += jnp.dot(x_ref[...], w_ref[...],
                            preferred_element_type=jnp.float32)

    @pl.when(pl.program_id(1) == pl.num_programs(1) - 1)
    def _():
        _linear_epilogue(acc_ref[...], b_ref, res_ref, g_ref, bln_ref, o_ref,
                         activation=activation, eps=eps)


def linear(x, w, b, *, activation=None, residual=None, ln_params=None,
           eps=LN_EPS, block_rows=256, block_k=None, out_dtype=ACT_DTYPE):
    """y = act(x @ w + b) [optionally y = LN(residual + x @ w + b)], bf16 output.

    block_rows: 256 is a safe default for v5e (16 MiB scoped VMEM default);
    on v6e raise to 512 (~85% of HBM roofline); re-derive for v7x's 64 MiB VMEM.
    """
    M, K = x.shape
    Kw, Nout = w.shape
    assert K == Kw
    fused_ln = ln_params is not None
    if fused_ln:
        assert residual is not None and residual.shape == (M, Nout)

    x = x.astype(MXU_DTYPE)
    w = w.astype(MXU_DTYPE)
    tm = min(block_rows, M)

    operands = [x, w, b.reshape(1, Nout)]
    if fused_ln:
        gamma, beta = ln_params
        operands += [residual, gamma.reshape(1, Nout), beta.reshape(1, Nout)]

    if block_k is None or block_k >= K:
        # ---- single K step: no scratch, direct lane-dense store ----
        grid = (pl.cdiv(M, tm),)
        in_specs = [
            pl.BlockSpec((tm, K), lambda i: (i, 0)),
            pl.BlockSpec((K, Nout), lambda i: (0, 0)),     # weight: constant block index
            pl.BlockSpec((1, Nout), lambda i: (0, 0)),
        ]
        if fused_ln:
            in_specs += [
                pl.BlockSpec((tm, Nout), lambda i: (i, 0)),
                pl.BlockSpec((1, Nout), lambda i: (0, 0)),
                pl.BlockSpec((1, Nout), lambda i: (0, 0)),
            ]
        out_specs = pl.BlockSpec((tm, Nout), lambda i: (i, 0))
        kernel = functools.partial(_linear_kernel, activation=activation,
                                   eps=eps, fused_ln=fused_ln)
        scratch_shapes = []
        dim_sem = ("parallel",)
    else:
        # ---- K-tiled accumulation path (large K at real model sizes) ----
        tk = block_k
        assert K % tk == 0, "K must be a multiple of block_k (ragged K tail would corrupt acc)"
        grid = (pl.cdiv(M, tm), K // tk)
        in_specs = [
            pl.BlockSpec((tm, tk), lambda i, k: (i, k)),
            pl.BlockSpec((tk, Nout), lambda i, k: (k, 0)),
            pl.BlockSpec((1, Nout), lambda i, k: (0, 0)),
        ]
        if fused_ln:
            in_specs += [
                pl.BlockSpec((tm, Nout), lambda i, k: (i, 0)),
                pl.BlockSpec((1, Nout), lambda i, k: (0, 0)),
                pl.BlockSpec((1, Nout), lambda i, k: (0, 0)),
            ]
        out_specs = pl.BlockSpec((tm, Nout), lambda i, k: (i, 0))
        kernel = functools.partial(_linear_kernel_kacc, activation=activation,
                                   eps=eps, fused_ln=fused_ln)
        scratch_shapes = [pltpu.VMEM((tm, Nout), jnp.float32)]
        dim_sem = ("parallel", "arbitrary")

    return pl.pallas_call(
        kernel,
        out_shape=jax.ShapeDtypeStruct((M, Nout), out_dtype),
        grid=grid,
        in_specs=in_specs,
        out_specs=out_specs,
        scratch_shapes=scratch_shapes,
        compiler_params=pltpu.CompilerParams(
            dimension_semantics=dim_sem,
            vmem_limit_bytes=VMEM_LIMIT),
    )(*operands)


# --------------------------------------------------------------------------
# Embedding sum + LayerNorm fused in one kernel (no f32 sum HBM round trip)
# --------------------------------------------------------------------------
def _embed_ln_kernel(w_ref, p_ref, t_ref, g_ref, b_ref, o_ref, *, eps):
    s = (w_ref[...].astype(jnp.float32)
         + p_ref[...].astype(jnp.float32)
         + t_ref[...].astype(jnp.float32))                 # (1,H) type row broadcasts
    o_ref[...] = _layernorm_f32(s, g_ref[...].astype(jnp.float32),
                                b_ref[...].astype(jnp.float32), eps).astype(o_ref.dtype)


def embed_layernorm(word_rows, pos_emb, type_row, gamma, beta, *, tokens,
                    eps=LN_EPS, out_dtype=ACT_DTYPE):
    M, H = word_rows.shape
    assert M % tokens == 0
    N = M // tokens
    return pl.pallas_call(
        functools.partial(_embed_ln_kernel, eps=eps),
        out_shape=jax.ShapeDtypeStruct((M, H), out_dtype),
        grid=(N,),
        in_specs=[
            pl.BlockSpec((tokens, H), lambda n: (n, 0)),   # gathered word rows
            pl.BlockSpec((tokens, H), lambda n: (0, 0)),   # position table (same every step)
            pl.BlockSpec((1, H), lambda n: (0, 0)),        # token-type-0 row
            pl.BlockSpec((1, H), lambda n: (0, 0)),        # gamma
            pl.BlockSpec((1, H), lambda n: (0, 0)),        # beta
        ],
        out_specs=pl.BlockSpec((tokens, H), lambda n: (n, 0)),
        compiler_params=pltpu.CompilerParams(dimension_semantics=("parallel",)),
    )(word_rows, pos_emb, type_row.reshape(1, H),
      gamma.reshape(1, H), beta.reshape(1, H))


# --------------------------------------------------------------------------
# Attention: one grid step per sentence, all heads, single lane-dense store
# --------------------------------------------------------------------------
def _attention_kernel(qkv_ref, mask_ref, o_ref, ctx_ref, *, num_heads, head_dim, scale):
    """qkv block (T, 3H) bf16; mask block (1, T); out (T, H) bf16; ctx scratch (T, H) f32."""
    mask = mask_ref[...].astype(jnp.float32)               # additive key-padding bias
    H = num_heads * head_dim
    # q/k/v are sliced per head directly from the ref (the whole (T,3H) tile is
    # never held live across the unrolled head loop -> bounded vreg pressure).
    for h in range(num_heads):
        q = qkv_ref[:, h * head_dim:(h + 1) * head_dim]                    # bf16
        k = qkv_ref[:, H + h * head_dim:H + (h + 1) * head_dim]            # bf16
        v = qkv_ref[:, 2 * H + h * head_dim:2 * H + (h + 1) * head_dim]    # bf16
        # scores = q @ k^T (contract head_dim of both, no explicit transpose)
        s = jax.lax.dot_general(q, k, (((1,), (1,)), ((), ())),
                                preferred_element_type=jnp.float32) * scale
        s = s + mask                                       # (1,T) broadcasts over queries
        s = s - jnp.max(s, axis=-1, keepdims=True)
        p = jnp.exp(s)
        p = p * pl.reciprocal(jnp.sum(p, axis=-1, keepdims=True), approx=True)
        ctx_ref[:, h * head_dim:(h + 1) * head_dim] = jnp.dot(
            p.astype(MXU_DTYPE), v, preferred_element_type=jnp.float32)
    # single full-width (lane-dense) store of the whole context tile
    o_ref[...] = ctx_ref[...].astype(o_ref.dtype)
    # TODO(synk): for realistic T (>=256) switch to a KV-tiled flash-style online
    # softmax (m/l/acc scratch); the all-at-once (T,T) score tile only fits at small T.


def attention(qkv, mask_add, *, num_heads, head_dim, tokens, out_dtype=ACT_DTYPE):
    """qkv: (N*T, 3H) fused projection (bf16), mask_add: (N, 1, T) -> context (N*T, H) bf16."""
    M, threeH = qkv.shape
    H = num_heads * head_dim
    assert threeH == 3 * H and M % tokens == 0
    N = M // tokens
    kernel = functools.partial(_attention_kernel, num_heads=num_heads,
                               head_dim=head_dim, scale=1.0 / math.sqrt(head_dim))
    return pl.pallas_call(
        kernel,
        out_shape=jax.ShapeDtypeStruct((M, H), out_dtype),
        grid=(N,),
        in_specs=[
            pl.BlockSpec((tokens, threeH), lambda n: (n, 0)),
            pl.BlockSpec((None, 1, tokens), lambda n: (n, 0, 0)),  # un-broadcast (1,T) mask
        ],
        out_specs=pl.BlockSpec((tokens, H), lambda n: (n, 0)),
        scratch_shapes=[pltpu.VMEM((tokens, H), jnp.float32)],
        compiler_params=pltpu.CompilerParams(dimension_semantics=("parallel",)),
    )(qkv, mask_add)


# --------------------------------------------------------------------------
# Synthetic mini-BERT built from the Pallas kernels
# --------------------------------------------------------------------------
def init_bert_params(key, *, vocab_size, hidden, num_layers, num_heads,
                     intermediate, max_pos, type_vocab=2, mxu_dtype=MXU_DTYPE):
    def nrm(k, shape, dtype=jnp.float32, scale=0.02):
        return (scale * jax.random.normal(k, shape)).astype(dtype)

    keys = jax.random.split(key, 5 + num_layers)
    params = {
        "word_emb": nrm(keys[0], (vocab_size, hidden)),
        "pos_emb": nrm(keys[1], (max_pos, hidden)),
        "type_emb": nrm(keys[2], (type_vocab, hidden)),
        "emb_ln_g": 1.0 + nrm(keys[3], (hidden,)),
        "emb_ln_b": nrm(keys[4], (hidden,)),
        "num_heads": num_heads,
        "hidden": hidden,
        "layers": [],
    }
    for li in range(num_layers):
        lk = jax.random.split(keys[5 + li], 16)
        wq = nrm(lk[0], (hidden, hidden))
        wk = nrm(lk[1], (hidden, hidden))
        wv = nrm(lk[2], (hidden, hidden))
        params["layers"].append({
            # fused QKV projection weight: (H, 3H), bf16 for the MXU
            "wqkv": jnp.concatenate([wq, wk, wv], axis=1).astype(mxu_dtype),
            "bqkv": nrm(lk[3], (3 * hidden,)),
            "wo": nrm(lk[4], (hidden, hidden), mxu_dtype),
            "bo": nrm(lk[5], (hidden,)),
            "ln1_g": 1.0 + nrm(lk[6], (hidden,)), "ln1_b": nrm(lk[7], (hidden,)),
            "w1": nrm(lk[8], (hidden, intermediate), mxu_dtype),
            "b1": nrm(lk[9], (intermediate,)),
            "w2": nrm(lk[10], (intermediate, hidden), mxu_dtype),
            "b2": nrm(lk[11], (hidden,)),
            "ln2_g": 1.0 + nrm(lk[12], (hidden,)), "ln2_b": nrm(lk[13], (hidden,)),
        })
    return params


def bert_forward(params, input_ids, attention_mask):
    """input_ids/attention_mask: (N, T) int32  ->  last hidden state (N, T, H) bf16."""
    N, T = input_ids.shape
    H = params["hidden"]
    nh = params["num_heads"]
    dh = H // nh

    # --- embeddings: gather is glue; sum + layer-norm fused in one Pallas kernel
    word_rows = params["word_emb"][input_ids].reshape(N * T, H)
    x = embed_layernorm(word_rows, params["pos_emb"][:T], params["type_emb"][0],
                        params["emb_ln_g"], params["emb_ln_b"], tokens=T)

    # additive key-padding mask, kept un-broadcast: (N, 1, T); broadcast in-kernel
    mask_add = ((1.0 - attention_mask.astype(jnp.float32)) * -10000.0).reshape(N, 1, T)

    for L in params["layers"]:
        qkv = linear(x, L["wqkv"], L["bqkv"])                                 # (N*T, 3H) bf16
        ctx = attention(qkv, mask_add, num_heads=nh, head_dim=dh, tokens=T)   # (N*T, H) bf16
        # attn-out projection with fused residual-add + LayerNorm epilogue
        x = linear(ctx, L["wo"], L["bo"], residual=x,
                   ln_params=(L["ln1_g"], L["ln1_b"]))
        ff = linear(x, L["w1"], L["b1"], activation="gelu")                   # (N*T, I) bf16
        # FF2 with fused residual-add + LayerNorm epilogue
        x = linear(ff, L["w2"], L["b2"], residual=x,
                   ln_params=(L["ln2_g"], L["ln2_b"]))

    return x.reshape(N, T, H)


# Pure-JAX reference (for correctness check of the Pallas kernels)
def bert_forward_ref(params, input_ids, attention_mask):
    N, T = input_ids.shape
    H = params["hidden"]
    nh = params["num_heads"]
    dh = H // nh

    def ln(x, g, b, eps=LN_EPS):
        m = jnp.mean(x, -1, keepdims=True)
        v = jnp.mean(jnp.square(x - m), -1, keepdims=True)
        return (x - m) * jax.lax.rsqrt(v + eps) * g + b

    x = (params["word_emb"][input_ids] + params["pos_emb"][:T][None]
         + params["type_emb"][0][None, None])
    x = ln(x.reshape(N * T, H), params["emb_ln_g"], params["emb_ln_b"])
    mask_add = (1.0 - attention_mask.astype(jnp.float32)) * -10000.0

    def heads(t):
        return t.reshape(N, T, nh, dh).transpose(0, 2, 1, 3)

    for L in params["layers"]:
        qkv = x @ L["wqkv"].astype(jnp.float32) + L["bqkv"]
        q, k, v = (heads(t) for t in jnp.split(qkv, 3, axis=-1))
        s = jnp.einsum("nhqd,nhkd->nhqk", q, k) / math.sqrt(dh)
        s = s + mask_add[:, None, None, :]
        p = jax.nn.softmax(s, axis=-1)
        ctx = jnp.einsum("nhqk,nhkd->nhqd", p, v).transpose(0, 2, 1, 3).reshape(N * T, H)
        x = ln(x + ctx @ L["wo"].astype(jnp.float32) + L["bo"], L["ln1_g"], L["ln1_b"])
        ff = jax.nn.gelu(x @ L["w1"].astype(jnp.float32) + L["b1"], approximate=False)
        x = ln(x + ff @ L["w2"].astype(jnp.float32) + L["b2"], L["ln2_g"], L["ln2_b"])
    return x.reshape(N, T, H)


# --------------------------------------------------------------------------
# The module being re-implemented
# --------------------------------------------------------------------------
class BertTokenEmbedder:
    def __init__(self, config):
        # "from_pretrained" replaced by deterministic synthetic init.
        self.params = init_bert_params(
            jax.random.PRNGKey(0),
            vocab_size=config["vocab_size"], hidden=config["hidden_size"],
            num_layers=config["num_layers"], num_heads=config["num_heads"],
            intermediate=config["intermediate_size"], max_pos=config["max_position"])
        self.bert_trainable = config["bert_trainable"]
        self.bert_hidden_size = config["hidden_size"]
        self.cacheable_tasks = config["cacheable_tasks"]
        # TODO(synk): param.requires_grad has no JAX equivalent (grads chosen via jax.grad argnums)

    def forward(self, batch):
        documents, sentences, tokens = batch["input_ids"].shape
        if "bert_embeddings" in batch:
            return batch["bert_embeddings"]
        attention_mask = batch["attention_mask"].reshape(-1, tokens)
        input_ids = batch["input_ids"].reshape(-1, tokens)
        bert_embeddings = bert_forward(self.params, input_ids, attention_mask)
        if not self.bert_trainable:
            # mirror of `.to('cpu')` caching; kept on device as JAX array
            batch["bert_embeddings"] = bert_embeddings
        return bert_embeddings


# --------------------------------------------------------------------------
if __name__ == "__main__":
    documents, sentences, tokens = 2, 2, 8
    hidden, num_heads, num_layers, intermediate = 32, 4, 2, 64
    vocab_size, max_position = 100, 16

    config = {
        "bert_model": "synthetic-mini-bert",
        "bert_trainable": False,
        "cacheable_tasks": [],
        "vocab_size": vocab_size,
        "hidden_size": hidden,
        "num_heads": num_heads,
        "num_layers": num_layers,
        "intermediate_size": intermediate,
        "max_position": max_position,
    }

    key = jax.random.PRNGKey(0)
    k_ids, _ = jax.random.split(key)
    input_ids = jax.random.randint(k_ids, (documents, sentences, tokens), 0, vocab_size,
                                   dtype=jnp.int32)
    # mask out the last two tokens of every second sentence (key padding)
    attention_mask = jnp.ones((documents, sentences, tokens), dtype=jnp.int32)
    attention_mask = attention_mask.at[:, 1, -2:].set(0)

    batch = {"input_ids": input_ids, "attention_mask": attention_mask}

    embedder = BertTokenEmbedder(config)
    out = embedder.forward(batch)
    out = jax.block_until_ready(out)

    # shape check: (documents*sentences, tokens, hidden)
    assert out.shape == (documents * sentences, tokens, hidden), out.shape
    assert bool(jnp.all(jnp.isfinite(out.astype(jnp.float32))))

    # correctness vs. pure-JAX reference (same bf16 weights; kernels keep bf16
    # activations on HBM + approx reciprocal softmax, hence the loose tolerance)
    ref = bert_forward_ref(embedder.params,
                           input_ids.reshape(-1, tokens),
                           attention_mask.reshape(-1, tokens))
    assert bool(jnp.allclose(out.astype(jnp.float32), ref, atol=5e-2, rtol=5e-2))

    # caching path (bert_trainable=False -> second call returns cached embeddings)
    out2 = embedder.forward(batch)
    assert out2 is batch["bert_embeddings"]

    print("KERNEL_OK")
</pallas_src>

<mosaic_0001>
module attributes {stable_mosaic.version = 11 : i64} {
  func.func @_embed_ln_kernel(%arg0: i32, %arg1: memref<8x32xf32, #tpu.memory_space<vmem>>, %arg2: memref<8x32xf32, #tpu.memory_space<vmem>>, %arg3: memref<1x32xf32, #tpu.memory_space<vmem>>, %arg4: memref<1x32xf32, #tpu.memory_space<vmem>>, %arg5: memref<1x32xf32, #tpu.memory_space<vmem>>, %arg6: memref<8x32xbf16, #tpu.memory_space<vmem>>) attributes {dimension_semantics = [#tpu.dimension_semantics<parallel>], iteration_bounds = array<i64: 4>, scalar_prefetch = 0 : i64, scratch_operands = 0 : i64, tpu.core_type = #tpu.core_type<tc>, window_params = [{transform_indices = @transform_0, window_bounds = array<i64: 8, 32>}, {pipeline_mode = #tpu.pipeline_mode<synchronous>, transform_indices = @transform_1, window_bounds = array<i64: 8, 32>}, {pipeline_mode = #tpu.pipeline_mode<synchronous>, transform_indices = @transform_2, window_bounds = array<i64: 1, 32>}, {pipeline_mode = #tpu.pipeline_mode<synchronous>, transform_indices = @transform_3, window_bounds = array<i64: 1, 32>}, {pipeline_mode = #tpu.pipeline_mode<synchronous>, transform_indices = @transform_4, window_bounds = array<i64: 1, 32>}, {transform_indices = @transform_5, window_bounds = array<i64: 8, 32>}]} {
    %c0 = arith.constant 0 : index
    %c0_0 = arith.constant 0 : index
    %0 = vector.load %arg1[%c0, %c0_0] : memref<8x32xf32, #tpu.memory_space<vmem>>, vector<8x32xf32>
    %c0_1 = arith.constant 0 : index
    %c0_2 = arith.constant 0 : index
    %1 = vector.load %arg2[%c0_1, %c0_2] : memref<8x32xf32, #tpu.memory_space<vmem>>, vector<8x32xf32>
    %2 = arith.addf %0, %1 : vector<8x32xf32>
    %c0_3 = arith.constant 0 : index
    %c0_4 = arith.constant 0 : index
    %3 = vector.load %arg3[%c0_3, %c0_4] : memref<1x32xf32, #tpu.memory_space<vmem>>, vector<1x32xf32>
    %4 = vector.broadcast %3 : vector<1x32xf32> to vector<8x32xf32>
    %5 = arith.addf %2, %4 : vector<8x32xf32>
    %c0_5 = arith.constant 0 : index
    %c0_6 = arith.constant 0 : index
    %6 = vector.load %arg4[%c0_5, %c0_6] : memref<1x32xf32, #tpu.memory_space<vmem>>, vector<1x32xf32>
    %c0_7 = arith.constant 0 : index
    %c0_8 = arith.constant 0 : index
    %7 = vector.load %arg5[%c0_7, %c0_8] : memref<1x32xf32, #tpu.memory_space<vmem>>, vector<1x32xf32>
    %cst = arith.constant dense<0.000000e+00> : vector<8xf32>
    %8 = vector.multi_reduction <add>, %5, %cst [1] : vector<8x32xf32> to vector<8xf32>
    %9 = vector.shape_cast %8 : vector<8xf32> to vector<8x1xf32>
    %cst_9 = arith.constant 3.200000e+01 : f32
    %10 = vector.broadcast %cst_9 : f32 to vector<8x1xf32>
    %11 = arith.divf %9, %10 : vector<8x1xf32>
    %12 = vector.broadcast %11 : vector<8x1xf32> to vector<8x32xf32>
    %13 = arith.subf %5, %12 : vector<8x32xf32>
    %14 = arith.mulf %13, %13 : vector<8x32xf32>
    %cst_10 = arith.constant dense<0.000000e+00> : vector<8xf32>
    %15 = vector.multi_reduction <add>, %14, %cst_10 [1] : vector<8x32xf32> to vector<8xf32>
    %16 = vector.shape_cast %15 : vector<8xf32> to vector<8x1xf32>
    %cst_11 = arith.constant 3.200000e+01 : f32
    %17 = vector.broadcast %cst_11 : f32 to vector<8x1xf32>
    %18 = arith.divf %16, %17 : vector<8x1xf32>
    %19 = vector.broadcast %11 : vector<8x1xf32> to vector<8x32xf32>
    %20 = arith.subf %5, %19 : vector<8x32xf32>
    %cst_12 = arith.constant 9.99999996E-13 : f32
    %21 = vector.broadcast %cst_12 : f32 to vector<8x1xf32>
    %22 = arith.addf %18, %21 : vector<8x1xf32>
    %23 = math.rsqrt %22 : vector<8x1xf32>
    %24 = vector.broadcast %23 : vector<8x1xf32> to vector<8x32xf32>
    %25 = arith.mulf %20, %24 : vector<8x32xf32>
    %26 = vector.broadcast %6 : vector<1x32xf32> to vector<8x32xf32>
    %27 = arith.mulf %25, %26 : vector<8x32xf32>
    %28 = vector.broadcast %7 : vector<1x32xf32> to vector<8x32xf32>
    %29 = arith.addf %27, %28 : vector<8x32xf32>
    %30 = arith.truncf %29 : vector<8x32xf32> to vector<8x32xbf16>
    %c0_13 = arith.constant 0 : index
    %c0_14 = arith.constant 0 : index
    %31 = vector.load %arg6[%c0_13, %c0_14] : memref<8x32xbf16, #tpu.memory_space<vmem>>, vector<8x32xbf16>
    tpu.vector_store %arg6[%c0_13, %c0_14], %30 {strides = array<i32>} : memref<8x32xbf16, #tpu.memory_space<vmem>>, vector<8x32xbf16>,
    return
  }
  func.func @transform_0(%arg0: i32) -> (i32, i32) {
    %c0_i32 = arith.constant 0 : i32
    %c0_i32_0 = arith.constant 0 : i32
    return %arg0, %c0_i32 : i32, i32
  }
  func.func @transform_1(%arg0: i32) -> (i32, i32) {
    %c0_i32 = arith.constant 0 : i32
    %c0_i32_0 = arith.constant 0 : i32
    %c0_i32_1 = arith.constant 0 : i32
    return %c0_i32, %c0_i32_0 : i32, i32
  }
  func.func @transform_2(%arg0: i32) -> (i32, i32) {
    %c0_i32 = arith.constant 0 : i32
    %c0_i32_0 = arith.constant 0 : i32
    %c0_i32_1 = arith.constant 0 : i32
    return %c0_i32, %c0_i32_0 : i32, i32
  }
  func.func @transform_3(%arg0: i32) -> (i32, i32) {
    %c0_i32 = arith.constant 0 : i32
    %c0_i32_0 = arith.constant 0 : i32
    %c0_i32_1 = arith.constant 0 : i32
    return %c0_i32, %c0_i32_0 : i32, i32
  }
  func.func @transform_4(%arg0: i32) -> (i32, i32) {
    %c0_i32 = arith.constant 0 : i32
    %c0_i32_0 = arith.constant 0 : i32
    %c0_i32_1 = arith.constant 0 : i32
    return %c0_i32, %c0_i32_0 : i32, i32
  }
  func.func @transform_5(%arg0: i32) -> (i32, i32) {
    %c0_i32 = arith.constant 0 : i32
    %c0_i32_0 = arith.constant 0 : i32
    return %arg0, %c0_i32 : i32, i32
  }
}

</mosaic_0001>

<bundles_post_ra>
// kernel: tpu_custom_call.1
= control target key start
LH: loop header
LB: loop body
LE: loop exit
PB: predicated region body
PF: predicated region fallthrough
CT: control target
= control target key end

     0   :  { %10 = vsyncpa [#allocation3], 0  ;;  %s795_s0 = inlined_call_operand.hbm [shape: f32[32,32], index: 0, kind: input, shape index: {}]   ;;  %s796_s1 = inlined_call_operand.hbm [shape: f32[8,32], index: 1, kind: input, shape index: {}]   ;;  %s797_s2 = inlined_call_operand.vmem [shape: f32[1,32], index: 2, kind: input, shape index: {}]   ;;  %s798_s3 = inlined_call_operand.vmem [shape: f32[1,32], index: 3, kind: input, shape index: {}]   ;;  %s799_s4 = inlined_call_operand.vmem [shape: f32[1,32], index: 4, kind: input, shape index: {}]   ;;  %s800_s5 = inlined_call_operand.hbm [shape: bf16[32,32], index: 5, kind: output, shape index: {}]  }
   0x1   :  { %12 = vsyncpa [#allocation3 + $0x1], 0 }
   0x2   :  { %13 = vsyncpa [#allocation6], 0 }
   0x3   :  { %14 = vsyncpa [#allocation4], 0 }
   0x4   :  { %16 = vsyncpa [#allocation4 + $0x1], 0  ;;  %s647_s18 = smov 0   ;;  %s649_s19 = smov 0  }
   0x5   :  { %s651_s20 = smov 0   ;;  %s653_s21 = smov 0  }
   0x6 LB: > { %s668_s22 = sadd.s32 4294967295, %s613_s21   ;;  %s404_s23 = sadd.s32 4294967294, %s613_s21   ;;  %s613_s21 = sphi %s653_s21, %s809_s21   ;;  %s609_s20 = sphi %s651_s20, %s808_s20   ;;  %s605_s19 = sphi %s649_s19, %s807_s19   ;;  %s601_s18 = sphi %s647_s18, %s806_s18  }
   0x7   : > { %p42_p0 = scmp.ne.s32.totalorder %s605_s19, %s601_s18  ;;  %p43_p1 = scmp.eq.s32.totalorder %s668_s22, 0 }
   0x8   : > { %p150_p2 = scmp.eq.s32.totalorder %s668_s22, 3  ;;  %p156_p3 = scmp.eq.s32.totalorder %s404_s23, 3 }
   0x9   : > { %p677_p4 = por %p43_p1, %p42_p0  ;;  %p405_p5 = scmp.ge.s32.totalorder %s613_s21, 1 }
   0xa   : > { %p682_p6 = por %p156_p3, %p42_p0  ;;  %p163_p7 = scmp.lt.s32.totalorder %s613_s21, 5 }
   0xb   : > { %s175_s28 = sshll.u32 %s796_s1, 4  ;;  %s615_s30 = smov [#allocation5]   ;;  %s176_s28 = int_to_ptr.hbm [resolvable:$true] %s175_s28 }
   0xc   : > { %p690_p8 = pnand %p405_p5, %p163_p7  ;;  %s177_s6 = sshll.u32 %s615_s30, 4  ;;  %s178_s6 = int_to_ptr.vmem [resolvable:$true] %s177_s6 }
   0xd   : > { %s699_s7 = sadd.s32 1, %s613_s21   ;;  %s29_s8 = sadd.s32 1, %s609_s20 }
   0xe   : > { %p426_p9 = pneg %p690_p8  ;;  %s26_s9 = ssub.s32 %s613_s21, %s699_s7 }
   0xf   : > { %p27_p11 = scmp.eq.s32.totalorder %s26_s9, 0  ;;  %p36_p12 = scmp.ne.s32.totalorder %s609_s20, %s605_s19 }
  0x10   : > { %p427_p10 = pnand %p426_p9, %p43_p1  ;;  %p37_p13 = scmp.eq.s32.totalorder %s613_s21, 0 }
  0x11   : > { %s708_s10 = scalar_select %p27_p11, %s609_s20, %s29_s8  }
  0x12   : > { %429 = dma.hbm_to_vmem [thread:$0]  (!%p427_p10), %s176_s28, 128, %s178_s6, [#allocation6]  }
  0x13   : > { %p712_p0 = por %p150_p2, %p36_p12  ;;  %p439_p3 = scmp.lt.s32.totalorder %s613_s21, 4 }
  0x14   : > { %s197_s12 = sand.u32 1, %s609_s20   ;;  %s409_s13 = sshll.u32 %s613_s21, 3 }
  0x15   : > { %p38_p5 = por %p37_p13, %p36_p12  ;;  %s408_s14 = sshll.u32 %s197_s12, 3 }
  0x16   : > { %s205_s17 = scalar_lea.hbm %s795_s0, %s409_s13  ;;  %s201_s26 = scalar_lea.vmem [#allocation2], %s408_s14 }
  0x17   : > { %s207_s23 = sshll.u32 %s205_s17, 4  ;;  %s209_s27 = sshll.u32 %s201_s26, 4  ;;  %s208_s23 = int_to_ptr.hbm [resolvable:$true] %s207_s23  ;;  %s210_s27 = int_to_ptr.vmem [resolvable:$true] %s209_s27 }
  0x18   : > { %p722_p7 = pnand %p439_p3, %p38_p5  ;;  %s198_s30 = scalar_lea.sflag [#allocation3], %s197_s12 }
  0x19   : > { %s513_s6 = sshra.s32 %s208_s23, 4  ;;  %s520_s14 = scalar_lea.hbm %s795_s0, 32  ;;  %s514_s6 = int_to_ptr.hbm [resolvable:$true] %s513_s6 }
  0x1a   : > { %s515_s8 = scalar_lea.hbm %s514_s6, 8  ;;  %p517_p9 = pneg %p722_p7 }
  0x1b   : > { %p516_p2 = scmp.ne.s32.totalorder %s514_s6, %s515_s8  ;;  %p521_p12 = scmp.lt.s32.totalorder %s514_s6, %s795_s0 }
  0x1c   : > { %p522_p13 = scmp.lt.s32.totalorder %s520_s14, %s515_s8 }
  0x1d   : > { %p518_p10 = pnand %p517_p9, %p516_p2 }
  0x1e   : > { %p523_p3 = por %p522_p13, %p521_p12 }
  0x1f   : > { %p519_p11 = pneg %p518_p10 }
  0x21   : > { %p524_p5 = pnand %p523_p3, %p519_p11 }
  0x23   : > { %527 = shalt.err (!%p524_p5)
}
  0x24   : > { %433 = dma.hbm_to_vmem [thread:$0]  (!%p722_p7), %s208_s23, 128, %s210_s27, %s198_s30  }
  0x25   : > { %218 = sbr.rel (%p690_p8) target bundleno = 323 (0x143), region = 40  ;;  %s739_s12 = sand.u32 (!%p690_p8), 1, %s605_s19  }
  0x26   : > { %s411_s17 = sshll.u32 (!%p690_p8), %s739_s12, 3  ;;  %s221_s26 = scalar_lea.sflag (!%p690_p8), [#allocation3], %s739_s12 }
  0x27   : > { %s224_s9 = scalar_lea.vmem (!%p690_p8), [#allocation2], %s411_s17 }
  0x2a   : > { %588 = dma.done.wait (%p677_p4), %s221_s26, 128  }
  0x2b   : > { %590 = vsyncadd (%p677_p4), %s221_s26, 4294967168 }
  0x2c   : > { %592 = dma.done.wait (%p43_p1), [#allocation6], 128  }
  0x2d   : > { %594 = vsyncadd (%p43_p1), [#allocation6], 4294967168  ;;  %v257_v0 = vld [vmem:[%s224_s9] sm:$0xff]  ;;  %v258_v1 = vld [vmem:[#allocation5] sm:$0xff]  ;;  %vm267_vm0 = vcmask 261120   ;;  %v616_v6 = vmov 32.0  }
  0x2e   : > { %v259_v2 = vadd.f32 %v258_v1, %v257_v0  ;;  %v476_v3 = vld [vmem:[%s797_s2] ss:$0 sm:$0xff]  ;;  %479 = vrcp.f32 %v616_v6  ;;  %s413_s24 = sshll.u32 %s739_s12, 2  ;;  %s415_s27 = sshll.u32 %s668_s22, 2  ;;  %vm306_vm5 = vcmask 257024  }
  0x2f   : > { %v477_v27 = vld [vmem:[%s798_s3] ss:$0 sm:$0xff]  ;;  %s319_s15 = scalar_lea.hbm %s800_s5, %s415_s27  ;;  %s256_s16 = scalar_lea.vmem [#allocation7], %s413_s24 }
  0x30   : > { %v264_v4 = vadd.f32 %v476_v3, %v259_v2  ;;  %v478_v29 = vld [vmem:[%s799_s4] ss:$0 sm:$0xff]  ;;  %s321_s22 = sshll.u32 %s256_s16, 4  ;;  %s323_s17 = sshll.u32 %s319_s15, 4  ;;  %s322_s22 = int_to_ptr.vmem [resolvable:$true] %s321_s22  ;;  %s324_s17 = int_to_ptr.hbm [resolvable:$true] %s323_s17 }
  0x31   : > { %s309_s26 = scalar_lea.sflag [#allocation4], %s739_s12  ;;  %s557_s9 = sshra.s32 %s324_s17, 4  ;;  %s558_s9 = int_to_ptr.hbm [resolvable:$true] %s557_s9 }
  0x32   : > { %v268_v5 = vsel %vm267_vm0, %v264_v4, 0.0  ;;  %s559_s29 = scalar_lea.hbm %s558_s9, 4  ;;  %s563_s24 = scalar_lea.hbm %s800_s5, 16 }
  0x33   : > { %269 = vadd.xlane.f32.xlu0 %v268_v5  ;;  %p560_p1 = scmp.ne.s32.totalorder %s558_s9, %s559_s29  ;;  %p564_p7 = scmp.lt.s32.totalorder %s558_s9, %s800_s5 }
  0x34   : > { %v480_v7 = vpop.eup %479  ;;  %p565_p2 = scmp.lt.s32.totalorder %s563_s24, %s559_s29 }
  0x35   : > { %v272_v8 = vmul.f32 32.0, %v480_v7  ;;  %vm276_vm1 = vweird.f32 %v480_v7  ;;  %p561_p4 = pnand %p560_p1, %p712_p0 }
  0x36   : > { %p566_p9 = por %p565_p2, %p564_p7 }
  0x37   : > { %v273_v9 = vsub.f32 1.0, %v272_v8  ;;  %p562_p8 = pneg %p561_p4 }
  0x39   : > { %v274_v10 = vmul.f32 %v480_v7, %v273_v9  ;;  %p567_p10 = pnand %p566_p9, %p562_p8 }
  0x3b   : > { %v275_v11 = vadd.f32 %v480_v7, %v274_v10 }
  0x3d   : > { %v277_v12 = vsel %vm276_vm1, %v480_v7, %v275_v11 }
  0xa6   : > { %v270_v13 = vpop.xlane.xlu0 %269 }
  0xa7   : > { %v278_v14 = vmul.f32 %v277_v12, %v270_v13 }
  0xa9   : > { %v279_v15 = vsub.f32 %v264_v4, %v278_v14 }
  0xab   : > { %v280_v16 = vmul.f32 %v279_v15, %v279_v15 }
  0xad   : > { %v281_v17 = vsel %vm267_vm0, %v280_v16, 0.0 }
  0xae   : > { %282 = vadd.xlane.f32.xlu0 %v281_v17 }
 0x121   : > { %v283_v18 = vpop.xlane.xlu0 %282 }
 0x122   : > { %v284_v19 = vmul.f32 %v283_v18, %v277_v12 }
 0x124   : > { %v285_v20 = vadd.f32 1e-12, %v284_v19 }
 0x126   : > { %481 = vrsqrt.f32 %v285_v20  ;;  %vm292_vm3 = vweird.f32 %v285_v20 }
 0x12c   : > { %v482_v21 = vpop.eup %481 }
 0x12d   : > { %v287_v22 = vmul.f32 %v482_v21, %v285_v20  ;;  %vm293_vm2 = vweird.f32 %v482_v21 }
 0x12e   : > { %vm294_vm4 = vmor %vm292_vm3, %vm293_vm2 }
 0x12f   : > { %v288_v23 = vmul.f32 %v482_v21, %v287_v22 }
 0x131   : > { %v289_v24 = vmul.f32 0.5, %v288_v23 }
 0x133   : > { %v290_v25 = vsub.f32 1.5, %v289_v24 }
 0x135   : > { %v291_v26 = vmul.f32 %v482_v21, %v290_v25 }
 0x137   : > { %v295_v28 = vsel %vm294_vm4, %v482_v21, %v291_v26 }
 0x138   : > { %v296_v30 = vmul.f32 %v295_v28, %v279_v15 }
 0x13a   : > { %v300_v31 = vmul.f32 %v477_v27, %v296_v30 }
 0x13c   : > { %v304_v32 = vadd.f32 %v478_v29, %v300_v31 }
 0x13e   : > { %v305_v33 = vpack.c.bf16 %v304_v32, %v304_v32 }
 0x140   : > { %307 = vst.msk [vmem:[%s256_s16] sm:$0xf] %vm306_vm5, %v305_v33 }
 0x141   : > { %570 = shalt.err (!%p567_p10)
}
 0x142   : > { %424 = dma.vmem_to_hbm [thread:$0]  (%p712_p0), %s322_s22, 64, %s324_s17, %s309_s26  }
 0x143 PF: > { %p441_p11 = scmp.ge.s32.totalorder %s613_s21, 2  ;;  %s335_s12 = sand.u32 1, %s601_s18  }
 0x144   : > { %s336_s6 = scalar_lea.sflag [#allocation4], %s335_s12 }
 0x145   : > { %p435_p12 = pnand %p441_p11, %p682_p6 }
 0x147   : > { %p436_p13 = pneg %p435_p12 }
 0x149   : > { %596 = dma.done.wait (%p436_p13), %s336_s6, 64  }
 0x14a   : > { %598 = vsyncadd (%p436_p13), %s336_s6, 4294967232  ;;  %p19_p3 = scmp.ge.s32.totalorder %s699_s7, 6   ;;  %s806_s18 = smov %s605_s19 }
 0x14b   : > { %s807_s19 = smov %s609_s20  ;;  %s808_s20 = smov %s708_s10 }
 0x14c   : > { %s809_s21 = smov %s699_s7  ;;  %21 = sbr.rel (!%p19_p3) target bundleno = 6 (0x6), region = 89 }
 0x151   :  { %342 = vsyncpa [#allocation3], 1 }
 0x152   :  { %344 = vsyncpa [#allocation3 + $0x1], 1 }
 0x153   :  { %345 = vsyncpa [#allocation6], 1 }
 0x154   :  { %346 = vsyncpa [#allocation4], 1 }
 0x155   :  { %348 = vsyncpa [#allocation4 + $0x1], 1 }

</bundles_post_ra>
